<compile_context>
chip_gen: v7x
topology: tpu7x:2x2x1
jax: 0.10.0
libtpu: 0.0.40
codegen_flags: <defaults>
</compile_context>

<pallas_src>
import functools

import jax
import jax.numpy as jnp
from jax.experimental import pallas as pl
from jax.experimental.pallas import tpu as pltpu


def _center_loss_kernel(x_ref, a_ref, w_ref, out_ref, *, batch):
    x = x_ref[...].astype(jnp.float32)   # (B+S, D): rows [:B]=embedding, [B:]=sce
    a = a_ref[...]                       # (B+S, 2) f32 row weights, zero on sce rows
    w = w_ref[0, 0]                      # SMEM scalar

    eps = jnp.float32(1e-6)              # F.pairwise_distance default eps

    a1 = a[:, 0:1]                       # (B+S, 1) = l1 * dim / (mask1.sum() + 1e-5)
    a2 = a[:, 1:2]                       # (B+S, 1) = l2 * dim / (mask2.sum() + 1e-5)

    # Class centers; the weights already carry dim/(mask_sum+1e-5), and the sce
    # rows have zero weight so they drop out of the sums.
    c1 = jnp.sum(a1 * x, axis=0, keepdims=True)            # (1, D)
    c2 = jnp.sum(a2 * x, axis=0, keepdims=True)            # (1, D)

    # One distance pass per center over the combined (B+S, D) block.
    # (Elementwise form kept on purpose: MXU norm-expansion only pays at D>~512.)
    def pdist(c):
        d = x - c + eps                                     # ||x - c + eps||_2 per row
        return jnp.sqrt(jnp.sum(d * d, axis=1, keepdims=True))   # (B+S, 1)

    d1 = pdist(c1)
    d2 = pdist(c2)

    # (c1_cluster + c2_cluster) and (c1_dist + c2_dist); the per-row weights
    # already fold in the binary-label masks, reciprocals and `dim`.
    cluster_sum = jnp.sum(d1 * a1 + d2 * a2)
    dist_sum = jnp.sum(d1 * a2 + d2 * a1)

    cd = c2 - c1 + eps
    c_dist = jnp.sqrt(jnp.sum(cd * cd))                     # F.pairwise_distance(c2, c1)

    ds1 = d1[batch:, :]                                     # (S, 1): dist(sce, c1)
    ds2 = w * d2[batch:, :]                                 # (S, 1): w * dist(sce, c2)
    sce_min = jnp.max(jnp.minimum(ds2, ds1))                # names follow the reference
    sce_max = jnp.min(jnp.maximum(ds2, ds1))

    out_ref[0, 0] = (1.0 / (c_dist + sce_max) + cluster_sum
                     + 1.0 / dist_sum + sce_min)


def center_loss(embedding, label, sce, w=0.95):
    B, D = embedding.shape
    S = sce.shape[0]

    # Wrapper-side (XLA) prep: fold masks + reciprocals + dim into row weights.
    lab = label.astype(jnp.float32)
    l1 = lab[:, 0]
    l2 = lab[:, 1]
    dim = jnp.float32(D)
    a1 = l1 * (dim / (dim * jnp.sum(l1) + 1e-5))
    a2 = l2 * (dim / (dim * jnp.sum(l2) + 1e-5))
    a = jnp.concatenate(
        [jnp.stack([a1, a2], axis=1), jnp.zeros((S, 2), jnp.float32)], axis=0)

    # Keep the native dtype on the big operands (bf16 stays bf16 in HBM/VMEM);
    # the kernel upcasts in-register.
    xdt = jnp.promote_types(embedding.dtype, sce.dtype)
    x = jnp.concatenate([embedding.astype(xdt), sce.astype(xdt)], axis=0)

    w_arr = jnp.asarray(w, jnp.float32).reshape(1, 1)   # data, not a compile constant

    kernel = functools.partial(_center_loss_kernel, batch=B)
    out = pl.pallas_call(
        kernel,
        out_shape=jax.ShapeDtypeStruct((1, 1), jnp.float32),
        in_specs=[
            pl.BlockSpec(memory_space=pltpu.MemorySpace.VMEM),   # x = [emb; sce]
            pl.BlockSpec(memory_space=pltpu.MemorySpace.VMEM),   # row weights
            pl.BlockSpec(memory_space=pltpu.MemorySpace.SMEM),   # w scalar
        ],
        out_specs=pl.BlockSpec(memory_space=pltpu.MemorySpace.SMEM),
    )(x, a, w_arr)
    # TODO(synk): when many (embedding, label, sce) instances are evaluated per
    # step, stack them behind a leading grid axis and set
    # pltpu.CompilerParams(dimension_semantics=("parallel", ...)) so the work is
    # sharded across v7x's two TensorCores; a single instance is launch-bound.
    # TODO(synk): if B*D grows past a few MiB, tile over B on an "arbitrary"
    # axis, hoist c1/c2 to a wrapper (2,B)x(B,D) einsum, and set
    # vmem_limit_bytes explicitly (v7x: 64 MiB VMEM ceiling; v5e: 16 MiB scoped
    # default) so the block size stays safe across chip generations.
    return out[0, 0]


def _center_loss_ref(embedding, label, sce, w=0.95):
    # Pure-JAX reference mirroring the PyTorch forward exactly (no dedup).
    emb = embedding.astype(jnp.float32)
    lab = label.astype(jnp.float32)
    sce = sce.astype(jnp.float32)
    B, D = emb.shape
    dim = float(D)
    l1, l2 = lab[:, 0:1], lab[:, 1:2]
    e1, e2 = l1 * emb, l2 * emb
    m1, m2 = dim * jnp.sum(l1), dim * jnp.sum(l2)
    c1 = dim * jnp.sum(e1, axis=0) / (m1 + 1e-5)
    c2 = dim * jnp.sum(e2, axis=0) / (m2 + 1e-5)
    pd = lambda x, c: jnp.sqrt(jnp.sum((x - c[None, :] + 1e-6) ** 2, axis=1))
    c1c = dim * jnp.sum(pd(e1, c1) * l1[:, 0]) / (m1 + 1e-5)
    c2c = dim * jnp.sum(pd(e2, c2) * l2[:, 0]) / (m2 + 1e-5)
    c1d = dim * jnp.sum(pd(e2, c1) * l2[:, 0]) / (m2 + 1e-5)
    c2d = dim * jnp.sum(pd(e1, c2) * l1[:, 0]) / (m1 + 1e-5)
    c_dist = jnp.sqrt(jnp.sum((c2 - c1 + 1e-6) ** 2))
    d1, d2 = pd(sce, c1), w * pd(sce, c2)
    sce_min = jnp.max(jnp.minimum(d2, d1))
    sce_max = jnp.min(jnp.maximum(d2, d1))
    return 1.0 / (c_dist + sce_max) + c1c + c2c + 1.0 / (c1d + c2d) + sce_min


if __name__ == "__main__":
    key = jax.random.PRNGKey(0)
    k_emb, k_lab, k_sce = jax.random.split(key, 3)

    B, D, S = 8, 32, 8
    embedding = jax.random.normal(k_emb, (B, D), dtype=jnp.float32)
    # Two-class one-hot labels, as the forward expects label[:, 0] / label[:, 1].
    cls = jax.random.bernoulli(k_lab, 0.5, (B,)).astype(jnp.int32)
    label = jnp.stack([cls, 1 - cls], axis=1).astype(jnp.int32)   # (B, 2)
    sce = jax.random.normal(k_sce, (S, D), dtype=jnp.float32)

    ok = True
    for wv in (0.95, 0.5):     # second value checks the SMEM-scalar w path (no recompile needed)
        out = center_loss(embedding, label, sce, w=wv)
        jax.block_until_ready(out)
        ref = _center_loss_ref(embedding, label, sce, w=wv)
        ok = ok and bool(jnp.allclose(out, ref, rtol=1e-4, atol=1e-4))
        assert ok, (wv, out, ref)

    print("KERNEL_OK")
</pallas_src>

<mosaic_0001>
module attributes {stable_mosaic.version = 11 : i64} {
  func.func @_center_loss_kernel(%arg0: memref<16x32xf32, #tpu.memory_space<vmem>>, %arg1: memref<16x2xf32, #tpu.memory_space<vmem>>, %arg2: memref<1x1xf32, #tpu.memory_space<smem>>, %arg3: memref<1x1xf32, #tpu.memory_space<smem>>) attributes {dimension_semantics = [], scalar_prefetch = 0 : i64, scratch_operands = 0 : i64, tpu.core_type = #tpu.core_type<tc>} {
    %c0 = arith.constant 0 : index
    %c0_0 = arith.constant 0 : index
    %0 = vector.load %arg0[%c0, %c0_0] : memref<16x32xf32, #tpu.memory_space<vmem>>, vector<16x32xf32>
    %c0_1 = arith.constant 0 : index
    %c0_2 = arith.constant 0 : index
    %1 = vector.load %arg1[%c0_1, %c0_2] : memref<16x2xf32, #tpu.memory_space<vmem>>, vector<16x2xf32>
    %c0_3 = arith.constant 0 : index
    %c0_4 = arith.constant 0 : index
    %2 = memref.load %arg2[%c0_3, %c0_4] : memref<1x1xf32, #tpu.memory_space<smem>>
    %3 = vector.extract_strided_slice %1 {offsets = [0, 0], sizes = [16, 1], strides = [1, 1]} : vector<16x2xf32> to vector<16x1xf32>
    %4 = vector.extract_strided_slice %1 {offsets = [0, 1], sizes = [16, 1], strides = [1, 1]} : vector<16x2xf32> to vector<16x1xf32>
    %5 = vector.broadcast %3 : vector<16x1xf32> to vector<16x32xf32>
    %6 = arith.mulf %5, %0 : vector<16x32xf32>
    %cst = arith.constant dense<0.000000e+00> : vector<32xf32>
    %7 = vector.multi_reduction <add>, %6, %cst [0] : vector<16x32xf32> to vector<32xf32>
    %8 = vector.shape_cast %7 : vector<32xf32> to vector<1x32xf32>
    %9 = vector.broadcast %4 : vector<16x1xf32> to vector<16x32xf32>
    %10 = arith.mulf %9, %0 : vector<16x32xf32>
    %cst_5 = arith.constant dense<0.000000e+00> : vector<32xf32>
    %11 = vector.multi_reduction <add>, %10, %cst_5 [0] : vector<16x32xf32> to vector<32xf32>
    %12 = vector.shape_cast %11 : vector<32xf32> to vector<1x32xf32>
    %13 = vector.broadcast %8 : vector<1x32xf32> to vector<16x32xf32>
    %14 = arith.subf %0, %13 : vector<16x32xf32>
    %cst_6 = arith.constant 9.99999997E-7 : f32
    %15 = vector.broadcast %cst_6 : f32 to vector<16x32xf32>
    %16 = arith.addf %14, %15 : vector<16x32xf32>
    %17 = arith.mulf %16, %16 : vector<16x32xf32>
    %cst_7 = arith.constant dense<0.000000e+00> : vector<16xf32>
    %18 = vector.multi_reduction <add>, %17, %cst_7 [1] : vector<16x32xf32> to vector<16xf32>
    %19 = vector.shape_cast %18 : vector<16xf32> to vector<16x1xf32>
    %20 = math.sqrt %19 : vector<16x1xf32>
    %21 = vector.broadcast %12 : vector<1x32xf32> to vector<16x32xf32>
    %22 = arith.subf %0, %21 : vector<16x32xf32>
    %cst_8 = arith.constant 9.99999997E-7 : f32
    %23 = vector.broadcast %cst_8 : f32 to vector<16x32xf32>
    %24 = arith.addf %22, %23 : vector<16x32xf32>
    %25 = arith.mulf %24, %24 : vector<16x32xf32>
    %cst_9 = arith.constant dense<0.000000e+00> : vector<16xf32>
    %26 = vector.multi_reduction <add>, %25, %cst_9 [1] : vector<16x32xf32> to vector<16xf32>
    %27 = vector.shape_cast %26 : vector<16xf32> to vector<16x1xf32>
    %28 = math.sqrt %27 : vector<16x1xf32>
    %29 = arith.mulf %20, %3 : vector<16x1xf32>
    %30 = arith.mulf %28, %4 : vector<16x1xf32>
    %31 = arith.addf %29, %30 : vector<16x1xf32>
    %32 = vector.shape_cast %31 : vector<16x1xf32> to vector<1x16x1xf32>
    %cst_10 = arith.constant dense<0.000000e+00> : vector<1xf32>
    %33 = vector.multi_reduction <add>, %32, %cst_10 [1, 2] : vector<1x16x1xf32> to vector<1xf32>
    %34 = vector.shape_cast %33 : vector<1xf32> to vector<1x1x1xf32>
    %35 = vector.extract %34[0, 0, 0] : f32 from vector<1x1x1xf32>
    %36 = arith.mulf %20, %4 : vector<16x1xf32>
    %37 = arith.mulf %28, %3 : vector<16x1xf32>
    %38 = arith.addf %36, %37 : vector<16x1xf32>
    %39 = vector.shape_cast %38 : vector<16x1xf32> to vector<1x16x1xf32>
    %cst_11 = arith.constant dense<0.000000e+00> : vector<1xf32>
    %40 = vector.multi_reduction <add>, %39, %cst_11 [1, 2] : vector<1x16x1xf32> to vector<1xf32>
    %41 = vector.shape_cast %40 : vector<1xf32> to vector<1x1x1xf32>
    %42 = vector.extract %41[0, 0, 0] : f32 from vector<1x1x1xf32>
    %43 = arith.subf %12, %8 : vector<1x32xf32>
    %cst_12 = arith.constant 9.99999997E-7 : f32
    %44 = vector.broadcast %cst_12 : f32 to vector<1x32xf32>
    %45 = arith.addf %43, %44 : vector<1x32xf32>
    %46 = arith.mulf %45, %45 : vector<1x32xf32>
    %47 = vector.shape_cast %46 : vector<1x32xf32> to vector<1x1x32xf32>
    %cst_13 = arith.constant dense<0.000000e+00> : vector<1xf32>
    %48 = vector.multi_reduction <add>, %47, %cst_13 [1, 2] : vector<1x1x32xf32> to vector<1xf32>
    %49 = vector.shape_cast %48 : vector<1xf32> to vector<1x1x1xf32>
    %50 = vector.extract %49[0, 0, 0] : f32 from vector<1x1x1xf32>
    %51 = math.sqrt %50 : f32
    %52 = vector.extract_strided_slice %20 {offsets = [8, 0], sizes = [8, 1], strides = [1, 1]} : vector<16x1xf32> to vector<8x1xf32>
    %53 = vector.extract_strided_slice %28 {offsets = [8, 0], sizes = [8, 1], strides = [1, 1]} : vector<16x1xf32> to vector<8x1xf32>
    %54 = vector.broadcast %2 : f32 to vector<8x1xf32>
    %55 = arith.mulf %54, %53 : vector<8x1xf32>
    %56 = arith.minimumf %55, %52 : vector<8x1xf32>
    %57 = vector.shape_cast %56 : vector<8x1xf32> to vector<1x8x1xf32>
    %cst_14 = arith.constant dense<0xFF800000> : vector<1xf32>
    %58 = vector.multi_reduction <maximumf>, %57, %cst_14 [1, 2] : vector<1x8x1xf32> to vector<1xf32>
    %59 = vector.shape_cast %58 : vector<1xf32> to vector<1x1x1xf32>
    %60 = vector.extract %59[0, 0, 0] : f32 from vector<1x1x1xf32>
    %61 = arith.maximumf %55, %52 : vector<8x1xf32>
    %62 = vector.shape_cast %61 : vector<8x1xf32> to vector<1x8x1xf32>
    %cst_15 = arith.constant dense<0x7F800000> : vector<1xf32>
    %63 = vector.multi_reduction <minimumf>, %62, %cst_15 [1, 2] : vector<1x8x1xf32> to vector<1xf32>
    %64 = vector.shape_cast %63 : vector<1xf32> to vector<1x1x1xf32>
    %65 = vector.extract %64[0, 0, 0] : f32 from vector<1x1x1xf32>
    %66 = arith.addf %51, %65 : f32
    %cst_16 = arith.constant 1.000000e+00 : f32
    %67 = arith.divf %cst_16, %66 : f32
    %68 = arith.addf %67, %35 : f32
    %cst_17 = arith.constant 1.000000e+00 : f32
    %69 = arith.divf %cst_17, %42 : f32
    %70 = arith.addf %68, %69 : f32
    %71 = arith.addf %70, %60 : f32
    %c0_18 = arith.constant 0 : index
    %c0_19 = arith.constant 0 : index
    %72 = memref.load %arg3[%c0_18, %c0_19] : memref<1x1xf32, #tpu.memory_space<smem>>
    memref.store %71, %arg3[%c0_18, %c0_19] : memref<1x1xf32, #tpu.memory_space<smem>>
    return
  }
}

</mosaic_0001>

<bundles_post_ra>
// kernel: tpu_custom_call.1
= control target key start
LH: loop header
LB: loop body
LE: loop exit
PB: predicated region body
PF: predicated region fallthrough
CT: control target
= control target key end

     0   :  { %v284_v1 = vmov 1   ;;  %v285_v2 = vmov 0   ;;  %s383_s0 = inlined_call_operand.vmem [shape: f32[16,32], index: 0, kind: input, shape index: {}]   ;;  %s384_s1 = inlined_call_operand.vmem [shape: f32[16,2], index: 1, kind: input, shape index: {}]   ;;  %s385_s2 = inlined_call_operand.<no memory space> [shape: f32[1,1], index: 2, kind: input, shape index: {}]   ;;  %s386_s3 = inlined_call_operand.hbm [shape: f32[1,1], index: 3, kind: output, shape index: {}]  }
   0x1   :  { %v312_v0 = vld [vmem:[%s384_s1] sm:$0xff]  ;;  %256 = vset.pattern.permute.xlu0 %v284_v1  ;;  %257 = vset.pattern.permute.xlu1 %v285_v2 }
   0x2   :  { %9 = vsyncpa [#allocation4], 0  ;;  %23 = vperm.xlu1 %257, %v312_v0   ;;  %44 = vperm.xlu0 %256, %v312_v0   ;;  %v319_v3 = vld [vmem:[%s384_s1 + $0x8] sm:$0xff]  ;;  %v16_v5 = vld [vmem:[%s383_s0] sm:$0xff]  ;;  %vm33_vm0 = vcmask 261120   ;;  %s287_s21 = smov 127  }
   0x3   :  { %v17_v8 = vld [vmem:[%s383_s0 + $0x8] sm:$0xff]  ;;  %s286_s0 = smov 1   ;;  %vm128_vm9 = vcmask 7168   ;;  %vm172_vm10 = vcmask 253952   ;;  %s272_s8 = scalar_lea.hbm %s386_s3, 16 }
   0x4   :  { %p273_p0 = scmp.ne.s32.totalorder %s386_s3, %s272_s8  ;;  %p276_p1 = scmp.lt.u32.totalorder %s272_s8, %s386_s3 }
   0x6   :  { %28 = vperm.xlu1 %257, %v319_v3   ;;  %48 = vperm.xlu0 %256, %v319_v3   ;;  %p278_p2 = pnand %p276_p1, %p273_p0 }
  0x81   :  { %v24_v4 = vpop.permute.xlu1 %23  ;;  %v45_v6 = vpop.permute.xlu0 %44 }
  0x82   :  { %v31_v7 = vmul.f32 %v24_v4, %v16_v5  ;;  %v51_v9 = vmul.f32 %v45_v6, %v16_v5  ;;  %v192_v4 = vstv %s385_s2 }
  0x84   :  { %v34_v12 = vsel %vm33_vm0, %v31_v7, 0.0  ;;  %v53_v15 = vsel %vm33_vm0, %v51_v9, 0.0 }
  0x85   :  { %v29_v10 = vpop.permute.xlu1 %28  ;;  %v49_v11 = vpop.permute.xlu0 %48 }
  0x86   :  { %v32_v13 = vmul.f32 %v29_v10, %v17_v8  ;;  %v52_v14 = vmul.f32 %v49_v11, %v17_v8 }
  0x88   :  { %v35_v16 = vsel %vm33_vm0, %v32_v13, 0.0  ;;  %v54_v17 = vsel %vm33_vm0, %v52_v14, 0.0 }
  0x89   :  { %v36_v18 = vadd.f32 %v35_v16, %v34_v12  ;;  %v55_v19 = vadd.f32 %v54_v17, %v53_v15 }
  0x8b   :  { %v37_v20 = vrot.slane %v36_v18, 4  ;;  %v56_v21 = vrot.slane %v55_v19, 4 }
  0x8d   :  { %v38_v22 = vadd.f32 %v37_v20, %v36_v18  ;;  %v57_v23 = vadd.f32 %v56_v21, %v55_v19 }
  0x8f   :  { %v39_v24 = vrot.slane %v38_v22, 2  ;;  %v58_v25 = vrot.slane %v57_v23, 2 }
  0x91   :  { %v40_v26 = vadd.f32 %v39_v24, %v38_v22  ;;  %v59_v27 = vadd.f32 %v58_v25, %v57_v23 }
  0x93   :  { %v41_v28 = vrot.slane %v40_v26, 1  ;;  %v60_v29 = vrot.slane %v59_v27, 1 }
  0x95   :  { %v333_v30 = vadd.f32 %v60_v29, %v59_v27  ;;  %v335_v31 = vadd.f32 %v41_v28, %v40_v26 }
  0x97   :  { %v89_v32 = vsub.f32 %v17_v8, %v333_v30  ;;  %v88_v33 = vsub.f32 %v16_v5, %v333_v30  ;;  %v62_v34 = vsub.f32 %v16_v5, %v335_v31  ;;  %v63_v35 = vsub.f32 %v17_v8, %v335_v31 }
  0x98   :  { %v169_v36 = vsub.f32 %v333_v30, %v335_v31 }
  0x99   :  { %v91_v37 = vadd.f32 1e-06, %v89_v32  ;;  %v90_v38 = vadd.f32 1e-06, %v88_v33  ;;  %v64_v39 = vadd.f32 1e-06, %v62_v34 }
  0x9a   :  { %v65_v43 = vadd.f32 1e-06, %v63_v35  ;;  %v170_v28 = vadd.f32 1e-06, %v169_v36 }
  0x9b   :  { %v93_v40 = vmul.f32 %v91_v37, %v91_v37  ;;  %v92_v41 = vmul.f32 %v90_v38, %v90_v38  ;;  %v66_v42 = vmul.f32 %v64_v39, %v64_v39 }
  0x9c   :  { %v67_v47 = vmul.f32 %v65_v43, %v65_v43  ;;  %v171_v32 = vmul.f32 %v170_v28, %v170_v28 }
  0x9d   :  { %v97_v44 = vsel %vm33_vm0, %v93_v40, 0.0  ;;  %v94_v45 = vsel %vm33_vm0, %v92_v41, 0.0  ;;  %v68_v46 = vsel %vm33_vm0, %v66_v42, 0.0 }
  0x9e   :  { %98 = vadd.xlane.f32.xlu1 %v97_v44  ;;  %95 = vadd.xlane.f32.xlu0 %v94_v45  ;;  %v71_v48 = vsel %vm33_vm0, %v67_v47, 0.0 }
  0xa2   :  { %69 = vadd.xlane.f32.xlu0 %v68_v46 }
  0xa6   :  { %72 = vadd.xlane.f32.xlu0 %v71_v48 }
 0x12b   :  { %v99_v49 = vpop.xlane.xlu1 %98  ;;  %v96_v50 = vpop.xlane.xlu0 %95 }
 0x12c   :  { %258 = vrsqrt.f32 %v99_v49  ;;  %vm109_vm1 = vcmp.eq.f32.partialorder %v99_v49, inf  ;;  %v112_v57 = vand.u32 2147483648, %v99_v49  ;;  %vm102_vm2 = vcmp.eq.f32.partialorder %v96_v50, inf }
 0x12d   :  { %260 = vrsqrt.f32 %v96_v50  ;;  %v105_v58 = vand.u32 2147483648, %v96_v50  ;;  %vm111_vm3 = vcmp.eq.f32.partialorder %v99_v49, 0.0  ;;  %vm104_vm4 = vcmp.eq.f32.partialorder %v96_v50, 0.0 }
 0x12f   :  { %v70_v51 = vpop.xlane.xlu0 %69 }
 0x130   :  { %vm76_vm7 = vcmp.eq.f32.partialorder %v70_v51, inf  ;;  %v79_v14 = vand.u32 2147483648, %v70_v51  ;;  %vm78_vm8 = vcmp.eq.f32.partialorder %v70_v51, 0.0 }
 0x133   :  { %v73_v52 = vpop.xlane.xlu0 %72 }
 0x134   :  { %262 = vrsqrt.f32 %v73_v52  ;;  %vm83_vm5 = vcmp.eq.f32.partialorder %v73_v52, inf  ;;  %v86_v5 = vand.u32 2147483648, %v73_v52  ;;  %vm85_vm6 = vcmp.eq.f32.partialorder %v73_v52, 0.0 }
 0x135   :  { %264 = vrsqrt.f32 %v70_v51 }
 0x136   :  { %v259_v53 = vpop.eup %258 }
 0x137   :  { %v261_v54 = vpop.eup %260  ;;  %v108_v55 = vmul.f32 %v259_v53, %v99_v49 }
 0x138   :  { %v101_v56 = vmul.f32 %v261_v54, %v96_v50 }
 0x139   :  { %v110_v59 = vsel %vm109_vm1, %v99_v49, %v108_v55 }
 0x13a   :  { %v103_v60 = vsel %vm102_vm2, %v96_v50, %v101_v56  ;;  %v113_v61 = vsel %vm111_vm3, %v112_v57, %v110_v59 }
 0x13b   :  { %v106_v62 = vsel %vm104_vm4, %v105_v58, %v103_v60  ;;  %v117_v63 = vmul.f32 %v113_v61, %v319_v3  ;;  %v193_v7 = vmul.f32 %v192_v4, %v113_v61 }
 0x13c   :  { %v116_v1 = vmul.f32 %v106_v62, %v312_v0 }
 0x13d   :  { %143 = vrot.lane.b32.xlu0 %v117_v63, %s286_s0 }
 0x13e   :  { %v263_v2 = vpop.eup %262  ;;  %141 = vrot.lane.b32.xlu1 %v116_v1, %s286_s0 }
 0x13f   :  { %v82_v6 = vmul.f32 %v263_v2, %v73_v52  ;;  %v265_v12 = vpop.eup %264 }
 0x140   :  { %v75_v13 = vmul.f32 %v265_v12, %v70_v51 }
 0x141   :  { %v84_v8 = vsel %vm83_vm5, %v73_v52, %v82_v6 }
 0x142   :  { %120 = vrot.lane.b32.xlu1 %v116_v1, %s287_s21  ;;  %v87_v9 = vsel %vm85_vm6, %v86_v5, %v84_v8  ;;  %v77_v15 = vsel %vm76_vm7, %v70_v51, %v75_v13 }
 0x143   :  { %v352_v10 = vmin.f32 %v193_v7, %v87_v9  ;;  %v354_v11 = vmax.f32 %v193_v7, %v87_v9  ;;  %v80_v16 = vsel %vm78_vm8, %v79_v14, %v77_v15  ;;  %v115_v17 = vmul.f32 %v87_v9, %v319_v3 }
 0x144   :  { %v114_v18 = vmul.f32 %v80_v16, %v312_v0  ;;  %v173_v0 = vsel %vm172_vm10, %v171_v32, 0.0 }
 0x145   :  { %v195_v57 = vrot.slane %v352_v10, 4  ;;  %v203_v58 = vrot.slane %v354_v11, 4 }
 0x146   :  { %122 = vrot.lane.b32.xlu1 %v117_v63, %s287_s21 }
 0x147   :  { %v196_v59 = vmax.f32 %v352_v10, %v195_v57  ;;  %v204_v61 = vmin.f32 %v354_v11, %v203_v58 }
 0x149   :  { %v197_v62 = vrot.slane %v196_v59, 2  ;;  %v205_v63 = vrot.slane %v204_v61, 2 }
 0x14b   :  { %v198_v1 = vmax.f32 %v196_v59, %v197_v62  ;;  %v206_v2 = vmin.f32 %v204_v61, %v205_v63 }
 0x14d   :  { %v199_v5 = vrot.slane %v198_v1, 1  ;;  %v207_v7 = vrot.slane %v206_v2, 1 }
 0x14f   :  { %v200_v13 = vmax.f32 %v198_v1, %v199_v5  ;;  %v208_v10 = vmin.f32 %v206_v2, %v207_v7 }
 0x1af   :  { %v144_v19 = vpop.permute.xlu0 %143 }
 0x1b0   :  { %v142_v20 = vpop.permute.xlu1 %141  ;;  %v148_v21 = vadd.f32 %v144_v19, %v115_v17 }
 0x1b1   :  { %v147_v22 = vadd.f32 %v142_v20, %v114_v18 }
 0x1b2   :  { %153 = vrot.lane.b32.xlu1 %v148_v21, %s287_s21 }
 0x1b3   :  { %151 = vrot.lane.b32.xlu0 %v147_v22, %s287_s21 }
 0x1b4   :  { %v121_v23 = vpop.permute.xlu1 %120 }
 0x1b5   :  { %v126_v26 = vadd.f32 %v121_v23, %v114_v18 }
 0x1b7   :  { %v129_v29 = vsel %vm128_vm9, %v126_v26, 0.0 }
 0x1b8   :  { %v123_v24 = vpop.permute.xlu1 %122 }
 0x1b9   :  { %v127_v25 = vadd.f32 %v123_v24, %v115_v17 }
 0x1bb   :  { %v130_v27 = vsel %vm128_vm9, %v127_v25, 0.0 }
 0x1bc   :  { %v131_v3 = vadd.f32 %v130_v27, %v129_v29 }
 0x1d2   :  { %132 = vadd.xlane.f32.xlu0 %v131_v3 }
 0x1d6   :  { %174 = vadd.xlane.f32.xlu0 %v173_v0 }
 0x224   :  { %v154_v33 = vpop.permute.xlu1 %153 }
 0x225   :  { %v158_v34 = vsel %vm128_vm9, %v154_v33, 0.0  ;;  %v152_v35 = vpop.permute.xlu0 %151 }
 0x226   :  { %v157_v37 = vsel %vm128_vm9, %v152_v35, 0.0 }
 0x227   :  { %v159_v38 = vadd.f32 %v158_v34, %v157_v37 }
 0x229   :  { %160 = vadd.xlane.f32.xlu1 %v159_v38 }
 0x25f   :  { %v133_v39 = vpop.xlane.xlu0 %132 }
 0x260   :  { %v134_v40 = vrot.slane %v133_v39, 4 }
 0x262   :  { %v135_v41 = vadd.f32 %v134_v40, %v133_v39 }
 0x263   :  { %v175_v36 = vpop.xlane.xlu0 %174 }
 0x264   :  { %v136_v42 = vrot.slane %v135_v41, 2  ;;  %v176_v44 = vrot.slane %v175_v36, 4 }
 0x266   :  { %v137_v43 = vadd.f32 %v136_v42, %v135_v41  ;;  %v177_v45 = vadd.f32 %v176_v44, %v175_v36 }
 0x268   :  { %v138_v30 = vrot.slane %v137_v43, 1  ;;  %v178_v46 = vrot.slane %v177_v45, 2 }
 0x26a   :  { %v139_v31 = vadd.f32 %v138_v30, %v137_v43  ;;  %v179_v50 = vadd.f32 %v178_v46, %v177_v45 }
 0x26c   :  { %235 = vpush %v139_v31  ;;  %v180_v53 = vrot.slane %v179_v50, 1 }
 0x26e   :  { %v181_v56 = vadd.f32 %v180_v53, %v179_v50 }
 0x29d   :  { %s363_s2 = spop %235 }
 0x2b6   :  { %v161_v47 = vpop.xlane.xlu1 %160 }
 0x2b7   :  { %v162_v48 = vrot.slane %v161_v47, 4 }
 0x2b9   :  { %v163_v49 = vadd.f32 %v162_v48, %v161_v47 }
 0x2bb   :  { %v164_v51 = vrot.slane %v163_v49, 2 }
 0x2bd   :  { %v165_v52 = vadd.f32 %v164_v51, %v163_v49 }
 0x2bf   :  { %v166_v54 = vrot.slane %v165_v52, 1 }
 0x2c1   :  { %v167_v55 = vadd.f32 %v166_v54, %v165_v52 }
 0x2c3   :  { %237 = vpush %v167_v55 }
 0x2c4   :  { %239 = vpush %v181_v56 }
 0x2f4   :  { %s365_s22 = spop %237 }
 0x2f5   :  { %s240_s23 = spop %239  ;;  %v215_v11 = vstv %s365_s22 }
 0x2f6   :  { %v183_v60 = vstv %s240_s23 }
 0x2f7   :  { %266 = vrsqrt.f32 %v183_v60  ;;  %vm186_vm11 = vcmp.eq.f32.partialorder %v183_v60, inf  ;;  %v189_v8 = vand.u32 2147483648, %v183_v60  ;;  %vm188_vm12 = vcmp.eq.f32.partialorder %v183_v60, 0.0 }
 0x301   :  { %v267_v4 = vpop.eup %266 }
 0x302   :  { %v185_v6 = vmul.f32 %v267_v4, %v183_v60 }
 0x304   :  { %v187_v9 = vsel %vm186_vm11, %v183_v60, %v185_v6 }
 0x305   :  { %v190_v12 = vsel %vm188_vm12, %v189_v8, %v187_v9 }
 0x306   :  { %241 = vpush %v190_v12 }
 0x307   :  { %243 = vpush %v200_v13 }
 0x308   :  { %245 = vpush %v208_v10 }
 0x337   :  { %s242_s24 = spop %241 }
 0x338   :  { %s244_s25 = spop %243 }
 0x339   :  { %s246_s26 = spop %245 }
 0x33a   :  { %s210_s27 = sadd.f32 %s246_s26, %s242_s24 }
 0x33c   :  { %v211_v14 = vstv %s210_s27 }
 0x33d   :  { %268 = vrcp.f32 %v211_v14 }
 0x33e   :  { %270 = vrcp.f32 %v215_v11 }
 0x347   :  { %v269_v15 = vpop.eup %268 }
 0x348   :  { %v271_v16 = vpop.eup %270  ;;  %247 = vpush %v269_v15 }
 0x349   :  { %249 = vpush %v271_v16 }
 0x379   :  { %s248_s28 = spop %247 }
 0x37a   :  { %s214_s29 = sadd.f32 %s248_s28, %s363_s2  ;;  %s250_s30 = spop %249 }
 0x37c   :  { %s218_s4 = sadd.f32 %s250_s30, %s214_s29 }
 0x37e   :  { %s219_s5 = sadd.f32 %s244_s25, %s218_s4 }
 0x380   :  { %221 = sst [smem:[#allocation3]] %s219_s5 }
 0x381   :  { %281 = shalt.err (!%p278_p2)
}
 0x382   :  { %s288_s13 = smov [#allocation3]  }
 0x383   :  { %229 = dma.smem_to_hbm %s288_s13, 16, %s386_s3, [#allocation4]  }
 0x384   :  { %282 = dma.done.wait [#allocation4], 16  }
 0x385   :  { %283 = vsyncadd [#allocation4], 4294967280 }
 0x386   :  { %233 = sfence }
 0x387   :  { %234 = vsyncpa [#allocation4], 1 }

</bundles_post_ra>
